<compile_context>
chip_gen: v7x
topology: tpu7x:2x2x1
jax: 0.10.0
libtpu: 0.0.40
codegen_flags: <defaults>
</compile_context>

<pallas_src>
import jax
import jax.numpy as jnp
from jax.experimental import pallas as pl
from jax.experimental.pallas import tpu as pltpu

LANE = 128


def _round_up(a: int, b: int) -> int:
    return (a + b - 1) // b * b


def _normalize_kernel(ab_ref, x_ref, o_ref):
    # ab_ref: (R, 2) per-row [1/std, -mean/std];  x_ref / o_ref: (R, TK) tiles.
    ab = ab_ref[...]
    a = ab[:, 0:1]
    b = ab[:, 1:2]
    o_ref[...] = x_ref[...] * a + b


def normalization(img, mean, std, *,
                  row_budget_bytes=4 * 1024 * 1024,
                  min_grid_steps=8,
                  min_tile_bytes=1 * 1024 * 1024):
    """(img - mean[None,:,None,None]) / std[None,:,None,None] for NCHW img."""
    N, C, H, W = img.shape
    dtype = img.dtype
    itemsize = jnp.dtype(dtype).itemsize
    sublane = max(8, (8 * 4) // itemsize)      # 8 (f32), 16 (bf16), 32 (int8/fp8)

    mean = jnp.asarray(mean, jnp.float32).reshape(-1)
    std = jnp.asarray(std, jnp.float32).reshape(-1)
    assert mean.shape == (C,) and std.shape == (C,)

    # Fold the normalization into a single mul-add:  o = x * a + b.
    a = 1.0 / std
    b = -mean * a
    # Per-row coefficients, row r = n*C + c  ->  channel c = r % C.
    ab = jnp.tile(jnp.stack([a, b], axis=-1).astype(dtype), (N, 1))   # (N*C, 2)

    M = N * C
    K = H * W
    x = img.reshape(M, K)          # lane-dense flat view; reshape is free

    # ---- lane-dim tile: full K when it fits, else a large multiple of 128 ----
    min_rows = max(1, min(M, sublane))
    tk_budget = max(LANE, row_budget_bytes // (itemsize * min_rows))
    if K <= tk_budget:
        TK = K                                  # == full array dim: always legal
    else:
        TK = max(LANE, (tk_budget // LANE) * LANE)

    # ---- row-dim tile; accounts for the lane-padded (R, 2) coefficient block ----
    max_rows = max(1, row_budget_bytes // ((TK + LANE) * itemsize))
    if M <= max_rows or M <= sublane:
        R = M                                   # == full array dim: always legal
    else:
        R = max(sublane, (max_rows // sublane) * sublane)

    grid_m = pl.cdiv(M, R)
    grid_k = pl.cdiv(K, TK)

    # ---- guarantee enough grid steps for v7x megacore (no-op for tiny inputs) ----
    while grid_m * grid_k < min_grid_steps:
        if R * TK * itemsize < 2 * min_tile_bytes:
            break                               # not worth splitting further
        new_r = None
        if R > sublane:
            cand = _round_up(-(-R // 2), sublane)
            if cand < R:
                new_r = cand
        if new_r is not None:                   # prefer splitting rows: keeps DMA
            R = new_r                           # runs lane-dense and long
            grid_m = pl.cdiv(M, R)
            continue
        new_tk = None
        if TK > LANE:
            cand = _round_up(-(-TK // 2), LANE)
            if cand < TK:
                new_tk = cand
        if new_tk is not None:
            TK = new_tk
            grid_k = pl.cdiv(K, TK)
            continue
        break

    out = pl.pallas_call(
        _normalize_kernel,
        out_shape=jax.ShapeDtypeStruct((M, K), dtype),
        grid=(grid_m, grid_k),
        in_specs=[
            pl.BlockSpec((R, 2), lambda i, j: (i, 0)),     # per-row [1/std, -mean/std]
            pl.BlockSpec((R, TK), lambda i, j: (i, j)),    # image tile
        ],
        out_specs=pl.BlockSpec((R, TK), lambda i, j: (i, j)),
        compiler_params=pltpu.CompilerParams(
            dimension_semantics=("parallel", "parallel"),
            vmem_limit_bytes=32 * 1024 * 1024,
        ),
    )(ab, x)

    return out.reshape(N, C, H, W)


def _reference(img, mean, std):
    mean = jnp.asarray(mean, img.dtype)
    std = jnp.asarray(std, img.dtype)
    return (img - mean[None, :, None, None]) / std[None, :, None, None]


if __name__ == "__main__":
    key = jax.random.PRNGKey(0)
    k1, k2, k3, k4, k5 = jax.random.split(key, 5)

    # ImageNet-style normalization constants (the module __init__ args).
    mean = jnp.array([0.485, 0.456, 0.406], dtype=jnp.float32)
    std = jnp.array([0.229, 0.224, 0.225], dtype=jnp.float32)

    # 1) Small NCHW image, H*W a multiple of 128 -> single full-dim tile.
    img = jax.random.uniform(k1, (2, 3, 16, 16), dtype=jnp.float32)
    out = jax.block_until_ready(normalization(img, mean, std))
    ref = _reference(img, mean, std)
    assert out.shape == img.shape and out.dtype == img.dtype
    assert jnp.allclose(out, ref, atol=1e-5, rtol=1e-5)

    # 2) Ragged H*W (= 400): full-dim lane block, no wrapper padding or slicing.
    img2 = jax.random.uniform(k2, (1, 3, 20, 20), dtype=jnp.float32)
    out2 = jax.block_until_ready(normalization(img2, mean, std))
    assert jnp.allclose(out2, _reference(img2, mean, std), atol=1e-5, rtol=1e-5)

    # 3) Force a multi-step cdiv grid with masked partial edge blocks on BOTH
    #    axes (rows 12 vs R=8, lanes 1280 vs TK=512) via a tiny tile budget.
    mean3 = jax.random.uniform(k3, (12,), minval=-0.5, maxval=0.5)
    std3 = jax.random.uniform(k4, (12,), minval=0.5, maxval=1.5)
    img3 = jax.random.uniform(k5, (1, 12, 32, 40), dtype=jnp.float32)
    out3 = jax.block_until_ready(
        normalization(img3, mean3, std3, row_budget_bytes=16 * 1024))
    assert jnp.allclose(out3, _reference(img3, mean3, std3), atol=1e-5, rtol=1e-5)

    print("KERNEL_OK")
</pallas_src>

<mosaic_0001>
module attributes {stable_mosaic.version = 11 : i64} {
  func.func @_normalize_kernel(%arg0: i32, %arg1: i32, %arg2: memref<6x2xf32, #tpu.memory_space<vmem>>, %arg3: memref<6x256xf32, #tpu.memory_space<vmem>>, %arg4: memref<6x256xf32, #tpu.memory_space<vmem>>) attributes {dimension_semantics = [#tpu.dimension_semantics<parallel>, #tpu.dimension_semantics<parallel>], iteration_bounds = array<i64: 1, 1>, scalar_prefetch = 0 : i64, scratch_operands = 0 : i64, tpu.core_type = #tpu.core_type<tc>, window_params = [{transform_indices = @transform_0, window_bounds = array<i64: 6, 2>}, {transform_indices = @transform_1, window_bounds = array<i64: 6, 256>}, {transform_indices = @transform_2, window_bounds = array<i64: 6, 256>}]} {
    %c0 = arith.constant 0 : index
    %c0_0 = arith.constant 0 : index
    %0 = vector.load %arg2[%c0, %c0_0] : memref<6x2xf32, #tpu.memory_space<vmem>>, vector<6x2xf32>
    %1 = vector.extract_strided_slice %0 {offsets = [0, 0], sizes = [6, 1], strides = [1, 1]} : vector<6x2xf32> to vector<6x1xf32>
    %2 = vector.extract_strided_slice %0 {offsets = [0, 1], sizes = [6, 1], strides = [1, 1]} : vector<6x2xf32> to vector<6x1xf32>
    %c0_1 = arith.constant 0 : index
    %c0_2 = arith.constant 0 : index
    %3 = vector.load %arg3[%c0_1, %c0_2] : memref<6x256xf32, #tpu.memory_space<vmem>>, vector<6x256xf32>
    %4 = vector.broadcast %1 : vector<6x1xf32> to vector<6x256xf32>
    %5 = arith.mulf %3, %4 : vector<6x256xf32>
    %6 = vector.broadcast %2 : vector<6x1xf32> to vector<6x256xf32>
    %7 = arith.addf %5, %6 : vector<6x256xf32>
    %c0_3 = arith.constant 0 : index
    %c0_4 = arith.constant 0 : index
    %8 = vector.load %arg4[%c0_3, %c0_4] : memref<6x256xf32, #tpu.memory_space<vmem>>, vector<6x256xf32>
    tpu.vector_store %arg4[%c0_3, %c0_4], %7 {strides = array<i32>} : memref<6x256xf32, #tpu.memory_space<vmem>>, vector<6x256xf32>,
    return
  }
  func.func @transform_0(%arg0: i32, %arg1: i32) -> (i32, i32) {
    %c0_i32 = arith.constant 0 : i32
    %c0_i32_0 = arith.constant 0 : i32
    return %arg0, %c0_i32 : i32, i32
  }
  func.func @transform_1(%arg0: i32, %arg1: i32) -> (i32, i32) {
    %c0_i32 = arith.constant 0 : i32
    return %arg0, %arg1 : i32, i32
  }
  func.func @transform_2(%arg0: i32, %arg1: i32) -> (i32, i32) {
    %c0_i32 = arith.constant 0 : i32
    return %arg0, %arg1 : i32, i32
  }
}

</mosaic_0001>

<bundles_post_ra>
// kernel: tpu_custom_call.1
= control target key start
LH: loop header
LB: loop body
LE: loop exit
PB: predicated region body
PF: predicated region fallthrough
CT: control target
= control target key end

     0   :  { %7 = vsyncpa [#allocation3], 0  ;;  %s157_s0 = inlined_call_operand.vmem [shape: f32[6,2], index: 0, kind: input, shape index: {}]   ;;  %s158_s1 = inlined_call_operand.hbm [shape: f32[6,256], index: 1, kind: input, shape index: {}]   ;;  %s159_s2 = inlined_call_operand.hbm [shape: f32[6,256], index: 2, kind: output, shape index: {}]  }
   0x1   :  { %8 = vsyncpa [#allocation4], 0  ;;  %s111_s9 = smov [#allocation2]   ;;  %s63_s13 = scalar_lea.hbm %s158_s1, 256 }
   0x2   :  { %s17_s10 = sshll.u32 %s111_s9, 4  ;;  %p64_p0 = scmp.ne.s32.totalorder %s158_s1, %s63_s13  ;;  %s18_s10 = int_to_ptr.vmem [resolvable:$true] %s17_s10 }
   0x3   :  { %p67_p1 = scmp.lt.u32.totalorder %s63_s13, %s158_s1 }
   0x5   :  { %p69_p2 = pnand %p67_p1, %p64_p0 }
   0x7   :  { %72 = shalt.err (!%p69_p2)
}
   0x8   :  { %s73_s18 = scalar_lea.vmem %s18_s10, 256  ;;  %p78_p4 = scmp.lt.s32.totalorder %s18_s10, %s18_s10 }
   0x9   :  { %p74_p3 = scmp.ne.s32.totalorder %s18_s10, %s73_s18  ;;  %p79_p5 = scmp.lt.s32.totalorder %s73_s18, %s73_s18 }
   0xb   :  { %p80_p6 = por %p79_p5, %p78_p4 }
   0xd   :  { %p81_p7 = pnand %p80_p6, %p74_p3 }
   0xf   :  { %84 = shalt.err (!%p81_p7)
}
  0x10   :  { %20 = dma.hbm_to_vmem [thread:$0]  %s158_s1, 256, %s18_s10, [#allocation3]  }
  0x11   :  { %107 = dma.done.wait [#allocation3], 256  }
  0x12   :  { %108 = vsyncadd [#allocation3], 4294967040  ;;  %v112_v0 = vmov 0   ;;  %v24_v1 = vld [vmem:[%s157_s0] sm:$0x3f]  ;;  %v113_v2 = vmov 1  }
  0x13   :  { %61 = vset.pattern.permute.xlu0 %v112_v0  ;;  %v25_v4 = vld [vmem:[#allocation2] sm:$0x3f]  ;;  %v26_v5 = vld [vmem:[#allocation2 + $0x8] sm:$0x3f]  ;;  %s114_s23 = smov [#allocation5]  }
  0x14   :  { %29 = vperm.xlu0 %61, %v24_v1   ;;  %s48_s24 = sshll.u32 %s114_s23, 4  ;;  %s49_s24 = int_to_ptr.vmem [resolvable:$true] %s48_s24 }
  0x15   :  { %s85_s1 = scalar_lea.vmem %s49_s24, 256  ;;  %p90_p9 = scmp.lt.s32.totalorder %s49_s24, %s49_s24 }
  0x16   :  { %p86_p8 = scmp.ne.s32.totalorder %s49_s24, %s85_s1  ;;  %p91_p10 = scmp.lt.s32.totalorder %s85_s1, %s85_s1 }
  0x18   :  { %62 = vset.pattern.permute.xlu0 %v113_v2  ;;  %p92_p11 = por %p91_p10, %p90_p9 }
  0x19   :  { %35 = vperm.xlu0 %62, %v24_v1  }
  0x1a   :  { %p93_p12 = pnand %p92_p11, %p86_p8 }
  0x93   :  { %v30_v3 = vpop.permute.xlu0 %29 }
  0x94   :  { %v32_v6 = vmul.f32 %v30_v3, %v25_v4  ;;  %v33_v7 = vmul.f32 %v30_v3, %v26_v5 }
  0x98   :  { %v36_v8 = vpop.permute.xlu0 %35 }
  0x99   :  { %v38_v9 = vadd.f32 %v36_v8, %v32_v6  ;;  %v39_v10 = vadd.f32 %v36_v8, %v33_v7 }
  0x9b   :  { %40 = vst [vmem:[#allocation5] sm:$0x3f] %v38_v9  ;;  %41 = vst [vmem:[#allocation5 + $0x8] sm:$0x3f] %v39_v10 }
  0x9c   :  { %96 = shalt.err (!%p93_p12)
}
  0x9d   :  { %s97_s26 = scalar_lea.hbm %s159_s2, 256 }
  0x9e   :  { %p98_p13 = scmp.ne.s32.totalorder %s159_s2, %s97_s26  ;;  %p101_p0 = scmp.lt.u32.totalorder %s97_s26, %s159_s2 }
  0xa0   :  { %p103_p1 = pnand %p101_p0, %p98_p13 }
  0xa2   :  { %106 = shalt.err (!%p103_p1)
}
  0xa3   :  { %51 = dma.vmem_to_hbm [thread:$0]  %s49_s24, 256, %s159_s2, [#allocation4]  }
  0xa4   :  { %109 = dma.done.wait [#allocation4], 256  }
  0xa5   :  { %110 = vsyncadd [#allocation4], 4294967040 }
  0xa6   :  { %55 = vsyncpa [#allocation3], 1 }
  0xa7   :  { %56 = vsyncpa [#allocation4], 1 }

</bundles_post_ra>
